<compile_context>
chip_gen: v5e
topology: v5e:2x2
jax: 0.10.0
libtpu: 0.0.40
codegen_flags: <defaults>
</compile_context>

<pallas_src>
import jax
import jax.numpy as jnp
from jax.experimental import pallas as pl
from jax.experimental.pallas import tpu as pltpu


def _round_up(x, m):
    return ((x + m - 1) // m) * m


def _cdiv(a, b):
    return (a + b - 1) // b


def _patch_matmul_kernel(x_ref, w_ref, o_ref):
    # x_ref: (tm, K) compute_dtype   w_ref: (K, N_pad) compute_dtype
    # o_ref: (tm, N_pad) out_dtype   -- one MXU matmul, f32 accumulation.
    o_ref[...] = jnp.dot(
        x_ref[...], w_ref[...], preferred_element_type=jnp.float32
    ).astype(o_ref.dtype)


def patch_embed_pallas(x, weight, patch_size, *,
                       compute_dtype=jnp.bfloat16, out_dtype=None):
    """x: (B, C, H, W).  weight: (d_model, C, P, P) (PyTorch Conv2d layout).

    Returns (B, n_patches, d_model).  compute_dtype=jnp.float32 is the exact-
    parity escape hatch; out_dtype defaults to x.dtype (f32), pass bf16 for
    bf16 downstream stacks to cut the dominant HBM write stream."""
    B, C, H, W = x.shape
    P = patch_size
    d_model = weight.shape[0]
    assert H % P == 0 and W % P == 0
    hp, wp = H // P, W // P
    n_patches = hp * wp
    if out_dtype is None:
        out_dtype = x.dtype

    # Cast BEFORE the patch rearrangement: if XLA materializes the transpose,
    # the staged copy is written/read in compute_dtype (half the f32 bytes).
    xc = x.astype(compute_dtype)
    # Patch extraction, (C, kh, kw) flatten order to match Conv2d weights:
    # (B, C, hp, P, wp, P) -> (B, hp, wp, C, P, P) -> (B*n_patches, C*P*P)
    xp = xc.reshape(B, C, hp, P, wp, P).transpose(0, 2, 4, 1, 3, 5)
    xp = xp.reshape(B * n_patches, C * P * P)
    # TODO(synk): verify in xprof that allow_input_fusion folds this transpose
    # into the kernel operand DMA; if it still emits a standalone copy, move
    # patch extraction into the kernel (grid over (B, hp)) to drop an HBM pass.

    # weight (d_model, C, P, P) -> (C*P*P, d_model) in compute_dtype.
    wm = weight.astype(compute_dtype).reshape(d_model, C * P * P).T

    M, K = xp.shape
    N = d_model

    # Only the output lane dim needs 128-alignment (unmasked vst).  K stays at
    # its true size: block dim == full array dim is allowed and Mosaic pads
    # the contraction dim internally.  The activation is never jnp.pad'ed.
    N_pad = _round_up(N, 128)
    if N_pad != N:
        wm = jnp.pad(wm, ((0, 0), (0, N_pad - N)))

    in_bytes = jnp.dtype(compute_dtype).itemsize
    out_bytes = jnp.dtype(out_dtype).itemsize
    pack = 16 if in_bytes < 4 else 8   # bf16 sublane packing granularity

    # Generation-gated VMEM budget (v7x: 64 MiB physical; v5e/v6e: 128 MiB).
    try:
        vmem_cap = pltpu.get_tpu_info().vmem_capacity_bytes
    except Exception:  # conservative fallback if the query is unavailable
        vmem_cap = 64 * 1024 * 1024
    vmem_limit = max(32 * 1024 * 1024,
                     min((vmem_cap * 3) // 4, 96 * 1024 * 1024))
    vmem_budget = (vmem_limit * 4) // 5

    # M tile: start large (amortize ~0.35us/step grid overhead), halve until
    # double-buffered x/out tiles plus the single-buffered weight fit.
    tm = 1024
    while tm > pack:
        need = (2 * tm * K * in_bytes          # x double buffer
                + 2 * tm * N_pad * out_bytes   # out double buffer
                + K * N_pad * in_bytes)        # resident weight, 1 buffer
        if need <= vmem_budget:
            break
        tm //= 2
    tm = max(tm, pack)
    tm = min(tm, _round_up(M, pack))
    # Keep the grid at >=2 steps whenever M permits so the "parallel" M axis
    # can be sharded across v7x's two TensorCores.
    if M > 256:
        tm = min(tm, max(256, _round_up(_cdiv(M, 2), pack)))

    grid = (_cdiv(M, tm),)

    cost = pl.CostEstimate(
        flops=2 * M * K * N,
        transcendentals=0,
        bytes_accessed=(M * K * in_bytes
                        + K * N_pad * in_bytes
                        + M * N_pad * out_bytes),
    )

    out = pl.pallas_call(
        _patch_matmul_kernel,
        out_shape=jax.ShapeDtypeStruct((M, N_pad), out_dtype),
        grid_spec=pltpu.PrefetchScalarGridSpec(
            num_scalar_prefetch=0,
            grid=grid,
            in_specs=[
                pl.BlockSpec((tm, K), lambda i: (i, 0)),
                # Constant block index: weight fetched once, stays resident;
                # single-buffered (a 2nd pipeline buffer is pure VMEM waste).
                pl.BlockSpec((K, N_pad), lambda i: (0, 0),
                             pipeline_mode=pl.Buffered(1)),
            ],
            out_specs=pl.BlockSpec((tm, N_pad), lambda i: (i, 0)),
        ),
        compiler_params=pltpu.CompilerParams(
            dimension_semantics=("parallel",),
            # Let XLA fuse the patch reshape/transpose/cast into the kernel's
            # x operand DMA rather than a separate HBM pass.
            allow_input_fusion=[True, False],
            vmem_limit_bytes=vmem_limit,
        ),
        cost_estimate=cost,
    )(xp, wm)

    out = out[:, :N]
    return out.reshape(B, n_patches, d_model)


if __name__ == "__main__":
    # Small shapes consistent with the module: img_size divisible by patch_size.
    B, C, img_size, patch_size, d_model = 2, 4, 16, 4, 32

    key = jax.random.PRNGKey(0)
    kx, kw = jax.random.split(key)
    x = jax.random.normal(kx, (B, C, img_size, img_size), dtype=jnp.float32)
    # Deterministic init of the Conv2d weight (d_model, C, P, P), bias=False.
    weight = jax.random.normal(
        kw, (d_model, C, patch_size, patch_size), dtype=jnp.float32
    ) * (1.0 / (C * patch_size * patch_size) ** 0.5)

    out = patch_embed_pallas(x, weight, patch_size)
    out = jax.block_until_ready(out)

    # Reference in plain JAX (strided conv == patch matmul) to sanity-check.
    hp = wp = img_size // patch_size
    ref = jax.lax.conv_general_dilated(
        x, weight,
        window_strides=(patch_size, patch_size),
        padding="VALID",
        dimension_numbers=("NCHW", "OIHW", "NCHW"),
    )  # (B, d_model, hp, wp)
    ref = ref.reshape(B, d_model, hp * wp).transpose(0, 2, 1)

    assert out.shape == (B, hp * wp, d_model)
    # bf16 inputs with f32 accumulation vs. an all-f32 reference: loose-ish tol.
    assert jnp.allclose(out, ref, atol=5e-2, rtol=5e-2)
    print("KERNEL_OK")
</pallas_src>

<mosaic_0001>
module attributes {stable_mosaic.version = 11 : i64} {
  func.func @_patch_matmul_kernel(%arg0: i32, %arg1: memref<32x64xbf16, #tpu.memory_space<vmem>>, %arg2: memref<64x128xbf16, #tpu.memory_space<vmem>>, %arg3: memref<32x128xf32, #tpu.memory_space<vmem>>) attributes {dimension_semantics = [#tpu.dimension_semantics<parallel>], iteration_bounds = array<i64: 1>, scalar_prefetch = 0 : i64, scratch_operands = 0 : i64, tpu.core_type = #tpu.core_type<tc>, window_params = [{transform_indices = @transform_0, window_bounds = array<i64: 32, 64>}, {pipeline_mode = #tpu.pipeline_mode<synchronous>, transform_indices = @transform_1, window_bounds = array<i64: 64, 128>}, {transform_indices = @transform_2, window_bounds = array<i64: 32, 128>}]} {
    %c0 = arith.constant 0 : index
    %c0_0 = arith.constant 0 : index
    %0 = vector.load %arg1[%c0, %c0_0] : memref<32x64xbf16, #tpu.memory_space<vmem>>, vector<32x64xbf16>
    %c0_1 = arith.constant 0 : index
    %c0_2 = arith.constant 0 : index
    %1 = vector.load %arg2[%c0_1, %c0_2] : memref<64x128xbf16, #tpu.memory_space<vmem>>, vector<64x128xbf16>
    %cst = arith.constant dense<0.000000e+00> : vector<32x128xf32>
    %2 = tpu.matmul %0, %1, %cst {dimension_numbers = #tpu.dot_dimension_numbers<[1], [0], [0], [1], [0, 0, 1, 1], [], []>} : vector<32x64xbf16>, vector<64x128xbf16>, vector<32x128xf32> -> vector<32x128xf32>
    %c0_3 = arith.constant 0 : index
    %c0_4 = arith.constant 0 : index
    %3 = vector.load %arg3[%c0_3, %c0_4] : memref<32x128xf32, #tpu.memory_space<vmem>>, vector<32x128xf32>
    tpu.vector_store %arg3[%c0_3, %c0_4], %2 {strides = array<i32>} : memref<32x128xf32, #tpu.memory_space<vmem>>, vector<32x128xf32>,
    return
  }
  func.func @transform_0(%arg0: i32) -> (i32, i32) {
    %c0_i32 = arith.constant 0 : i32
    %c0_i32_0 = arith.constant 0 : i32
    return %arg0, %c0_i32 : i32, i32
  }
  func.func @transform_1(%arg0: i32) -> (i32, i32) {
    %c0_i32 = arith.constant 0 : i32
    %c0_i32_0 = arith.constant 0 : i32
    %c0_i32_1 = arith.constant 0 : i32
    return %c0_i32, %c0_i32_0 : i32, i32
  }
  func.func @transform_2(%arg0: i32) -> (i32, i32) {
    %c0_i32 = arith.constant 0 : i32
    %c0_i32_0 = arith.constant 0 : i32
    return %arg0, %c0_i32 : i32, i32
  }
}

</mosaic_0001>

<bundles_post_ra>
// kernel: tpu_custom_call.1
= control target key start
LH: loop header
LB: loop body
LE: loop exit
PB: predicated region body
PF: predicated region fallthrough
CT: control target
= control target key end

     0   :  { %7 = vsyncpa [#allocation3], 0  ;;  %s293_s0 = inlined_call_operand.hbm [shape: bf16[32,64], index: 0, kind: input, shape index: {}]   ;;  %s294_s1 = inlined_call_operand.hbm [shape: bf16[64,128], index: 1, kind: input, shape index: {}]   ;;  %s295_s2 = inlined_call_operand.hbm [shape: f32[32,128], index: 2, kind: output, shape index: {}]  }
   0x1   :  { %8 = vsyncpa [#allocation6], 0 }
   0x2   :  { %9 = vsyncpa [#allocation4], 0  ;;  %s14_s11 = sshll.u32 %s293_s0, 4  ;;  %s262_s12 = smov [#allocation2]   ;;  %s15_s11 = int_to_ptr.hbm [resolvable:$true] %s14_s11 }
   0x3   :  { %s16_s13 = sshll.u32 %s262_s12, 4  ;;  %s27_s16 = sshll.u32 %s294_s1, 4  ;;  %s17_s13 = int_to_ptr.vmem [resolvable:$true] %s16_s13  ;;  %s28_s16 = int_to_ptr.hbm [resolvable:$true] %s27_s16 }
   0x4   :  { %s263_s17 = smov 64   ;;  %s264_s18 = smov 4  }
   0x5   :  { %22 = dma.hbm_to_vmem [thread:$0]  %s15_s11, 256, %s17_s13, [#allocation3], %s263_s17, %s263_s17, %s264_s18  }
   0x6   :  { %s265_s19 = smov [#allocation5]  }
   0x7   :  { %s29_s20 = sshll.u32 %s265_s19, 4  ;;  %s30_s20 = int_to_ptr.vmem [resolvable:$true] %s29_s20 }
   0x8   :  { %35 = dma.hbm_to_vmem [thread:$0]  %s28_s16, 512, %s30_s20, [#allocation6], %s263_s17, %s263_s17, %s264_s18  }
   0x9   :  { %256 = dma.done.wait [#allocation3], 256  }
   0xa   :  { %257 = vsyncadd [#allocation3], 4294967040 }
   0xb   :  { %258 = dma.done.wait [#allocation6], 512  }
   0xc   :  { %259 = vsyncadd [#allocation6], 4294966784  ;;  %v172_v0 = vld [vmem:[#allocation5 + $0x18] sm:$0xff]  ;;  %v171_v1 = vld [vmem:[#allocation5 + $0x10] sm:$0xff]  ;;  %vm91_vm0 = vcmask 523264   ;;  %s266_s0 = smov [#allocation7]  }
   0xd   :  { %102 = vmatpush.bf16.msra.mxu0 %v172_v0  ;;  %173 = vmatpush.bf16.msra.mxu1 %v172_v0  ;;  %v170_v2 = vld [vmem:[#allocation5 + $0x8] sm:$0xff]  ;;  %v169_v3 = vld [vmem:[#allocation5] sm:$0xff]  ;;  %v167_v4 = vld [vmem:[#allocation2] sm:$0xff]  ;;  %s125_s1 = sshll.u32 %s266_s0, 4  ;;  %s127_s23 = sshll.u32 %s295_s2, 4  ;;  %s126_s1 = int_to_ptr.vmem [resolvable:$true] %s125_s1  ;;  %s128_s23 = int_to_ptr.hbm [resolvable:$true] %s127_s23 }
   0xe   :  { %v168_v5 = vld [vmem:[#allocation2 + $0x8] sm:$0xff]  ;;  %s267_s24 = smov 128   ;;  %s268_s25 = smov 8  }
  0x11   :  { %103 = vmatpush.bf16.msra.mxu0 %v171_v1  ;;  %174 = vmatpush.bf16.msra.mxu1 %v171_v1 }
  0x15   :  { %104 = vmatpush.bf16.msra.mxu0 %v170_v2  ;;  %175 = vmatpush.bf16.msra.mxu1 %v170_v2 }
  0x19   :  { %105 = vmatpush.bf16.msra.mxu0 %v169_v3  ;;  %176 = vmatpush.bf16.msra.mxu1 %v169_v3 }
  0x1c   :  { %165 = vmatmul.msk.bf16.vlgmr.msra.gmra.mxu0 %vm91_vm0, %v167_v4  ;;  %166 = vmatmul.msk.bf16.vlgmr.msra.gmra.mxu1 %vm91_vm0, %v168_v5 }
  0x99   :  { %v107_v6 = vpop.f32.mrf.mxu0  ;;  %v112_v7 = vpop.f32.mrf.mxu1 }
  0x9a   :  { %117 = vst [vmem:[#allocation7] sm:$0xff] %v107_v6 }
  0x9b   :  { %119 = vst [vmem:[#allocation7 + $0x10] sm:$0xff] %v112_v7 }
  0xa1   :  { %v109_v8 = vpop.f32.mrf.mxu0  ;;  %v114_v9 = vpop.f32.mrf.mxu1 }
  0xa2   :  { %118 = vst [vmem:[#allocation7 + $0x8] sm:$0xff] %v109_v8 }
  0xa3   :  { %120 = vst [vmem:[#allocation7 + $0x18] sm:$0xff] %v114_v9 }
  0xa4   :  { %133 = dma.vmem_to_hbm [thread:$0]  %s126_s1, 512, %s128_s23, [#allocation4], %s267_s24, %s267_s24, %s268_s25  }
  0xa5   :  { %260 = dma.done.wait [#allocation4], 512  }
  0xa6   :  { %261 = vsyncadd [#allocation4], 4294966784 }
  0xa7   :  { %138 = vsyncpa [#allocation3], 1 }
  0xa8   :  { %139 = vsyncpa [#allocation6], 1 }
  0xa9   :  { %140 = vsyncpa [#allocation4], 1 }

</bundles_post_ra>
